<compile_context>
chip_gen: v7x
topology: tpu7x:2x2x1
jax: 0.10.0
libtpu: 0.0.40
codegen_flags: <defaults>
</compile_context>

<pallas_src>
import functools
import math

import jax
import jax.numpy as jnp
from jax.experimental import pallas as pl
from jax.experimental.pallas import tpu as pltpu


# ---------------------------------------------------------------------------
# PE table construction (plain JAX, runs once at module init -- not hot path)
# ---------------------------------------------------------------------------
def positionalencoding2d(d_model, height, width):
    """JAX port of the PyTorch helper: returns (d_model, height, width) f32."""
    if d_model % 4 != 0:
        raise ValueError(
            "Cannot use sin/cos positional encoding with odd dimension "
            f"(got dim={d_model})")
    half = d_model // 2
    div_term = jnp.exp(
        jnp.arange(0.0, half, 2, dtype=jnp.float32) * -(math.log(10000.0) / half))
    pos_w = jnp.arange(0.0, width, dtype=jnp.float32)[:, None]   # (W, 1)
    pos_h = jnp.arange(0.0, height, dtype=jnp.float32)[:, None]  # (H, 1)

    sin_w = jnp.sin(pos_w * div_term).T[:, None, :]   # (half/2, 1, W)
    cos_w = jnp.cos(pos_w * div_term).T[:, None, :]
    sin_h = jnp.sin(pos_h * div_term).T[:, :, None]   # (half/2, H, 1)
    cos_h = jnp.cos(pos_h * div_term).T[:, :, None]

    pe = jnp.zeros((d_model, height, width), jnp.float32)
    pe = pe.at[0:half:2].set(jnp.broadcast_to(sin_w, (half // 2, height, width)))
    pe = pe.at[1:half:2].set(jnp.broadcast_to(cos_w, (half // 2, height, width)))
    pe = pe.at[half::2].set(jnp.broadcast_to(sin_h, (half // 2, height, width)))
    pe = pe.at[half + 1::2].set(jnp.broadcast_to(cos_h, (half // 2, height, width)))
    return pe


# ---------------------------------------------------------------------------
# Layout / tile selection (byte-budgeted, lane-dense whenever possible)
# ---------------------------------------------------------------------------
_TILE_BUDGET_BYTES = 2 * 1024 * 1024   # per tile; ~6x this (double-buffered x/out + pe)
_MAX_LANES = 1024                      # lane-dense last dim (multiple of 128)


def _choose_layout(C, HW, itemsize):
    """Factor the per-batch slab of C*HW elements into (R rows, L lanes) + row tile.

    L is the largest multiple of 128 (<= _MAX_LANES) dividing C*HW; if none
    exists, fall back to channel-major (C, HW) with a (possibly masked) full
    pixel extent.  The row tile TR is the largest legal row count (multiple of
    8 dividing R, or R itself) whose (TR, L) tile fits the byte budget.
    """
    M = C * HW
    L = 0
    cand = (min(M, _MAX_LANES) // 128) * 128
    while cand >= 128:
        if M % cand == 0:
            L = cand
            break
        cand -= 128
    if L == 0:
        # TODO(synk): non-128-divisible C*H*W keeps masked (lane-padded) stores.
        R, L = C, HW
    else:
        R = M // L

    max_rows = max(1, _TILE_BUDGET_BYTES // (L * itemsize))
    tr = R  # full-extent rows is always a legal fallback (may exceed budget)
    for c in range(min(R, max_rows), 0, -1):
        if R % c == 0 and (c % 8 == 0 or c == R):
            tr = c
            break
    return R, L, tr


# ---------------------------------------------------------------------------
# Pallas kernel: out(n, r:r+tr, :) = x(n, r:r+tr, :) + pe(r:r+tr, :)
# ---------------------------------------------------------------------------
def _pe_add_kernel(x_ref, pe_ref, o_ref):
    # All refs are (TR, L); the batch dim of x/out is squeezed away.
    o_ref[...] = x_ref[...] + pe_ref[...]


def pe_add(seq, pe):
    """seq: (N, C, H, W); pe: (C, H, W), same dtype.  Returns seq + pe."""
    N, C, H, W = seq.shape
    HW = H * W
    R, L, tr = _choose_layout(C, HW, jnp.dtype(seq.dtype).itemsize)

    x = seq.reshape(N, R, L)        # free row-major refactorization
    pe_flat = pe.reshape(R, L)

    # Batch is the INNER grid axis: the pe block index (r, 0) is unchanged
    # across consecutive steps, so Pallas skips re-DMAing the PE tile -> the
    # PE table is read from HBM exactly once per launch.
    grid = (R // tr, N)

    out = pl.pallas_call(
        _pe_add_kernel,
        out_shape=jax.ShapeDtypeStruct((N, R, L), seq.dtype),
        grid_spec=pltpu.PrefetchScalarGridSpec(
            num_scalar_prefetch=0,
            grid=grid,
            in_specs=[
                pl.BlockSpec((None, tr, L), lambda r, n: (n, r, 0)),
                pl.BlockSpec((tr, L), lambda r, n: (r, 0)),
            ],
            out_specs=pl.BlockSpec((None, tr, L), lambda r, n: (n, r, 0)),
        ),
        compiler_params=pltpu.CompilerParams(
            dimension_semantics=("parallel", "parallel"),
            vmem_limit_bytes=32 * 1024 * 1024,
        ),
    )(x, pe_flat)
    return out.reshape(N, C, H, W)


# ---------------------------------------------------------------------------
# Module wrapper (mirrors PositionalEncoding2d.forward)
# ---------------------------------------------------------------------------
class PositionalEncoding2dPallas:
    def __init__(self, d_model, h: int = 30, w: int = 30):
        self.d_model = d_model
        self.h = h
        self.w = w
        self.pe = positionalencoding2d(d_model, h, w)   # (d_model, h, w) f32

    @functools.partial(jax.jit, static_argnums=0)
    def __call__(self, seq):
        # seq: (N, d_model, h, w) or (d_model, h, w); forward == seq + pe.
        squeeze = False
        if seq.ndim == 3:
            seq = seq[None]
            squeeze = True
        out = pe_add(seq, self.pe.astype(seq.dtype))
        return out[0] if squeeze else out

    def reference(self, seq):
        """Pure-JAX reference of the PyTorch forward."""
        return seq + self.pe.astype(seq.dtype)


if __name__ == "__main__":
    key = jax.random.PRNGKey(0)

    # Primary small case (lane-fused path: L=1024, R=8).
    d_model, h, w, batch = 32, 16, 16, 2
    model = PositionalEncoding2dPallas(d_model, h=h, w=w)
    x = jax.random.normal(key, (batch, d_model, h, w), jnp.float32)
    out = jax.block_until_ready(model(x))
    ref = model.reference(x)
    assert out.shape == (batch, d_model, h, w), out.shape
    assert jnp.allclose(out, ref, atol=1e-6, rtol=1e-6), \
        float(jnp.max(jnp.abs(out - ref)))

    # Extra coverage: module-default spatial size (30x30 -> L=640) and the
    # non-128-divisible fallback path (C*H*W = 144).
    for dm, hh, ww, nb in ((32, 30, 30, 2), (4, 6, 6, 2)):
        m = PositionalEncoding2dPallas(dm, h=hh, w=ww)
        xi = jax.random.normal(jax.random.PRNGKey(1), (nb, dm, hh, ww), jnp.float32)
        oi = jax.block_until_ready(m(xi))
        assert jnp.allclose(oi, m.reference(xi), atol=1e-6, rtol=1e-6)

    print("KERNEL_OK")
</pallas_src>

<mosaic_0001>
module attributes {stable_mosaic.version = 11 : i64} {
  func.func @_pe_add_kernel(%arg0: i32, %arg1: i32, %arg2: memref<1x8x1024xf32, #tpu.memory_space<vmem>>, %arg3: memref<8x1024xf32, #tpu.memory_space<vmem>>, %arg4: memref<1x8x1024xf32, #tpu.memory_space<vmem>>) attributes {dimension_semantics = [#tpu.dimension_semantics<parallel>, #tpu.dimension_semantics<parallel>], iteration_bounds = array<i64: 1, 2>, scalar_prefetch = 0 : i64, scratch_operands = 0 : i64, tpu.core_type = #tpu.core_type<tc>, window_params = [{transform_indices = @transform_0, window_bounds = array<i64: 1, 8, 1024>}, {transform_indices = @transform_1, window_bounds = array<i64: 8, 1024>}, {transform_indices = @transform_2, window_bounds = array<i64: 1, 8, 1024>}]} {
    %c0 = arith.constant 0 : index
    %c0_0 = arith.constant 0 : index
    %c0_1 = arith.constant 0 : index
    %0 = vector.load %arg2[%c0, %c0_0, %c0_1] : memref<1x8x1024xf32, #tpu.memory_space<vmem>>, vector<1x8x1024xf32>
    %1 = vector.shape_cast %0 : vector<1x8x1024xf32> to vector<8x1024xf32>
    %c0_2 = arith.constant 0 : index
    %c0_3 = arith.constant 0 : index
    %2 = vector.load %arg3[%c0_2, %c0_3] : memref<8x1024xf32, #tpu.memory_space<vmem>>, vector<8x1024xf32>
    %3 = arith.addf %1, %2 : vector<8x1024xf32>
    %c0_4 = arith.constant 0 : index
    %c0_5 = arith.constant 0 : index
    %c0_6 = arith.constant 0 : index
    %4 = vector.load %arg4[%c0_4, %c0_5, %c0_6] : memref<1x8x1024xf32, #tpu.memory_space<vmem>>, vector<1x8x1024xf32>
    %5 = vector.shape_cast %4 : vector<1x8x1024xf32> to vector<8x1024xf32>
    %6 = vector.shape_cast %3 : vector<8x1024xf32> to vector<1x8x1024xf32>
    tpu.vector_store %arg4[%c0_4, %c0_5, %c0_6], %6 {strides = array<i32>} : memref<1x8x1024xf32, #tpu.memory_space<vmem>>, vector<1x8x1024xf32>,
    return
  }
  func.func @transform_0(%arg0: i32, %arg1: i32) -> (i32, i32, i32) {
    %c0_i32 = arith.constant 0 : i32
    %c0_i32_0 = arith.constant 0 : i32
    return %arg1, %arg0, %c0_i32 : i32, i32, i32
  }
  func.func @transform_1(%arg0: i32, %arg1: i32) -> (i32, i32) {
    %c0_i32 = arith.constant 0 : i32
    %c0_i32_0 = arith.constant 0 : i32
    return %arg0, %c0_i32 : i32, i32
  }
  func.func @transform_2(%arg0: i32, %arg1: i32) -> (i32, i32, i32) {
    %c0_i32 = arith.constant 0 : i32
    %c0_i32_0 = arith.constant 0 : i32
    return %arg1, %arg0, %c0_i32 : i32, i32, i32
  }
}

</mosaic_0001>

<bundles_post_ra>
// kernel: a_call__.1
= control target key start
LH: loop header
LB: loop body
LE: loop exit
PB: predicated region body
PF: predicated region fallthrough
CT: control target
= control target key end

     0   :  { %s417_s9 = smov 0   ;;  %s419_s10 = smov 0   ;;  %s474_s0 = inlined_call_operand.vmem [shape: f32[2,8,1024], index: 0, kind: input, shape index: {}]   ;;  %s475_s1 = inlined_call_operand.vmem [shape: f32[8,1024], index: 1, kind: input, shape index: {}]   ;;  %s476_s2 = inlined_call_operand.vmem [shape: f32[2,8,1024], index: 2, kind: output, shape index: {}]  }
   0x1   :  { %s421_s11 = smov 0  }
   0x2 LB: > { %s21_s12 = sadd.s32 1, %s396_s10  ;;  %p345_p0 = scmp.ge.s32.totalorder %s400_s11, 1  ;;  %s400_s11 = sphi %s421_s11, %s12_s11   ;;  %s396_s10 = sphi %s419_s10, %s478_s10   ;;  %s392_s9 = sphi %s417_s9, %s477_s9  }
   0x3   : > { %p22_p1 = scmp.ge.s32.totalorder %s21_s12, 2  ;;  %p142_p2 = scmp.lt.s32.totalorder %s400_s11, 3 }
   0x5   : > { %s480_s12 = smov (%p22_p1, %s21_s12), 0  ;;  %p143_p3 = pnand %p345_p0, %p142_p2 }
   0x6   : > { %p177_p4 = scmp.lt.s32.totalorder (!%p143_p3), %s392_s9, 1  ;;  %v208_v0 = vld [vmem:[%s475_s1] sm:$0xff] (!%p143_p3)  ;;  %v209_v1 = vld [vmem:[%s475_s1 + $0x8] sm:$0xff] (!%p143_p3)  ;;  %v210_v2 = vld [vmem:[%s475_s1 + $0x10] sm:$0xff] (!%p143_p3) }
   0x7   : > { %146 = sbr.rel (%p143_p3) target bundleno = 24 (0x18), region = 28  ;;  %v211_v3 = vld [vmem:[%s475_s1 + $0x18] sm:$0xff] (!%p143_p3)  ;;  %v212_v4 = vld [vmem:[%s475_s1 + $0x20] sm:$0xff] (!%p143_p3)  ;;  %v213_v5 = vld [vmem:[%s475_s1 + $0x28] sm:$0xff] (!%p143_p3) }
   0x8   : > { %v214_v6 = vld [vmem:[%s475_s1 + $0x30] sm:$0xff] (!%p143_p3)  ;;  %v215_v7 = vld [vmem:[%s475_s1 + $0x38] sm:$0xff] (!%p143_p3) }
   0xe   : > { %s482_s9 = smov (!%p177_p4, %s392_s9), 1 }
   0xf   : > { %s352_s17 = sshll.u32 %s482_s9, 6 }
  0x10   : > { %s185_s26 = scalar_lea.vmem %s474_s0, %s352_s17  ;;  %s199_s7 = scalar_lea.vmem %s476_s2, %s352_s17 }
  0x11   : > { %v200_v8 = vld [vmem:[%s185_s26] sm:$0xff]  ;;  %v201_v9 = vld [vmem:[%s185_s26 + $0x8] sm:$0xff]  ;;  %v202_v10 = vld [vmem:[%s185_s26 + $0x10] sm:$0xff] }
  0x12   : > { %v216_v11 = vadd.f32 %v208_v0, %v200_v8  ;;  %v217_v12 = vadd.f32 %v209_v1, %v201_v9  ;;  %v218_v13 = vadd.f32 %v210_v2, %v202_v10  ;;  %v203_v14 = vld [vmem:[%s185_s26 + $0x18] sm:$0xff]  ;;  %v204_v15 = vld [vmem:[%s185_s26 + $0x20] sm:$0xff]  ;;  %v205_v16 = vld [vmem:[%s185_s26 + $0x28] sm:$0xff] }
  0x13   : > { %v219_v17 = vadd.f32 %v211_v3, %v203_v14  ;;  %v220_v18 = vadd.f32 %v212_v4, %v204_v15  ;;  %v221_v19 = vadd.f32 %v213_v5, %v205_v16  ;;  %v206_v20 = vld [vmem:[%s185_s26 + $0x30] sm:$0xff]  ;;  %v207_v21 = vld [vmem:[%s185_s26 + $0x38] sm:$0xff] }
  0x14   : > { %224 = vst [vmem:[%s199_s7] sm:$0xff] %v216_v11  ;;  %225 = vst [vmem:[%s199_s7 + $0x8] sm:$0xff] %v217_v12  ;;  %v222_v22 = vadd.f32 %v214_v6, %v206_v20  ;;  %v223_v23 = vadd.f32 %v215_v7, %v207_v21 }
  0x15   : > { %226 = vst [vmem:[%s199_s7 + $0x10] sm:$0xff] %v218_v13  ;;  %227 = vst [vmem:[%s199_s7 + $0x18] sm:$0xff] %v219_v17 }
  0x16   : > { %228 = vst [vmem:[%s199_s7 + $0x20] sm:$0xff] %v220_v18  ;;  %229 = vst [vmem:[%s199_s7 + $0x28] sm:$0xff] %v221_v19 }
  0x17   : > { %230 = vst [vmem:[%s199_s7 + $0x30] sm:$0xff] %v222_v22  ;;  %231 = vst [vmem:[%s199_s7 + $0x38] sm:$0xff] %v223_v23 }
  0x18 PF: > { %s12_s11 = sadd.s32 1, %s400_s11   ;;  %s477_s9 = smov %s396_s10 }
  0x19   : > { %p9_p5 = scmp.ge.s32.totalorder %s12_s11, 4   ;;  %s478_s10 = smov %s480_s12 }
  0x1b   :  { %11 = sbr.rel (!%p9_p5) target bundleno = 2 (0x2), region = 61 }

</bundles_post_ra>
